<compile_context>
chip_gen: v7x
topology: tpu7x:2x2x1
jax: 0.10.0
libtpu: 0.0.40
codegen_flags: <defaults>
</compile_context>

<pallas_src>
import math

import numpy as np
import jax
import jax.numpy as jnp
from jax.experimental import pallas as pl
from jax.experimental.pallas import tpu as pltpu

_LANE = 128
_VMEM_LIMIT_BYTES = 32 * 1024 * 1024  # safe scoped-VMEM budget on v5e/v6e/v7x


def _round_up(x, m):
    return ((x + m - 1) // m) * m


def _target_block_bytes():
    """~4 MiB blocks by default; ~6 MiB on v7x (64 MiB physical VMEM, ~3.2 TB/s HBM)."""
    try:
        info = pltpu.get_tpu_info()
        vmem = getattr(info, "vmem_capacity_bytes", None)
        if vmem is not None and vmem <= 64 * 1024 * 1024:
            return 6 * 1024 * 1024
    except Exception:
        pass
    return 4 * 1024 * 1024


# ---------------------------------------------------------------------------
# Kernels
# ---------------------------------------------------------------------------

def _split_kernel(half, v_f, x_f):
    # half % 128 == 0: both static slices are lane-tile aligned -> plain
    # unmasked vector loads / stores, scale is an immediate (no dtype promotion).
    def kernel(u_ref, o_ref):
        o_ref[:, :half] = u_ref[:, :half] * v_f
        o_ref[:, half:] = u_ref[:, half:] * x_f

    return kernel


def _col_split_kernel(n_v_blocks, v_f, x_f):
    # Column-tiled split path (huge D): each column block lies entirely inside
    # one half, so the scale is a scalar select on the column-block index.
    def kernel(u_ref, o_ref):
        scale = jnp.where(pl.program_id(1) < n_v_blocks, v_f, x_f)
        o_ref[...] = (u_ref[...] * scale).astype(o_ref.dtype)

    return kernel


def _row_scale_kernel(u_ref, s_ref, o_ref):
    # Per-lane scale is a precomputed (1, W) operand in the input dtype:
    # one broadcast + one VPU multiply per vreg, nothing else.
    o_ref[...] = u_ref[...] * s_ref[...]


def _col_iota_kernel(tn, half, v_f, x_f):
    # Cold fallback: huge, non-128-aligned D -> column tiles, scale chosen from
    # the absolute column index (block offset + lane iota).
    def kernel(u_ref, o_ref):
        m, w = u_ref.shape
        col = pl.program_id(1) * tn + jax.lax.broadcasted_iota(jnp.int32, (m, w), 1)
        scale = jnp.where(col < half, v_f, x_f)
        o_ref[...] = (u_ref[...] * scale).astype(o_ref.dtype)

    return kernel


# ---------------------------------------------------------------------------
# Wrapper
# ---------------------------------------------------------------------------

def scaler(u, scaling_factors=(1.0, 1.0), *, donate=False):
    """Apply Scaler.forward to `u` (shape (..., D), D even) via a Pallas kernel."""
    orig_shape = u.shape
    d = int(orig_shape[-1])
    assert d % 2 == 0 and d > 0, "last dimension must be even (chunk(2, dim=-1))"
    half = d // 2
    total = int(np.prod(orig_shape)) if len(orig_shape) else 1
    if total == 0:
        return u
    m = total // d

    v_f = float(scaling_factors[0])
    x_f = float(scaling_factors[1])

    itemsize = jnp.dtype(u.dtype).itemsize
    sublane = {4: 8, 2: 16, 1: 32}.get(itemsize, 8)
    tgt = _target_block_bytes()

    extra_inputs = []
    extra_specs = []
    col_grid = None

    if half % _LANE == 0:
        # ----- Path A: lane-tile-aligned halves ------------------------------
        work_shape = (m, d)
        rows, width = work_shape
        if sublane * d * itemsize <= tgt:
            tn = d
            kernel = _split_kernel(half, v_f, x_f)
        else:
            # Column tiling: tn is a multiple of 128 that divides `half`, so
            # every column block sits entirely in one half.
            max_g = max(1, tgt // (sublane * _LANE * itemsize))
            h_tiles = half // _LANE
            g = 1
            for cand in range(min(h_tiles, max_g), 0, -1):
                if h_tiles % cand == 0:
                    g = cand
                    break
            tn = g * _LANE
            col_grid = d // tn
            kernel = _col_split_kernel(half // tn, v_f, x_f)
    else:
        lcm_w = (d * _LANE) // math.gcd(d, _LANE)
        if total % lcm_w == 0 and sublane * lcm_w * itemsize <= tgt:
            # ----- Path B: lane-dense slab, width = lcm(D, 128) ---------------
            work_shape = (total // lcm_w, lcm_w)
            rows, width = work_shape
            tn = lcm_w
            lane = np.arange(lcm_w)
            scale_np = np.where((lane % d) < half, v_f, x_f).reshape(1, lcm_w)
            extra_inputs.append(jnp.asarray(scale_np, dtype=u.dtype))
            extra_specs.append(pl.BlockSpec((1, lcm_w), lambda i: (0, 0)))
            kernel = _row_scale_kernel
        else:
            # ----- Path C: (M, D) fallback ------------------------------------
            work_shape = (m, d)
            rows, width = work_shape
            padded_w = _round_up(d, _LANE)
            if sublane * padded_w * itemsize <= tgt:
                tn = d
                lane = np.arange(d)
                scale_np = np.where(lane < half, v_f, x_f).reshape(1, d)
                extra_inputs.append(jnp.asarray(scale_np, dtype=u.dtype))
                extra_specs.append(pl.BlockSpec((1, d), lambda i: (0, 0)))
                kernel = _row_scale_kernel
            else:
                # Huge unaligned D: 128-multiple column tiles + iota offset.
                tn = max(_LANE, (tgt // (sublane * itemsize)) // _LANE * _LANE)
                tn = min(tn, _round_up(d, _LANE))
                col_grid = pl.cdiv(d, tn)
                kernel = _col_iota_kernel(tn, half, v_f, x_f)

    # Row tile sized from PADDED bytes (lane dim rounded to 128, rows to sublane)
    # so the double-buffered pipeline stays inside the scoped-VMEM budget.
    padded_tn = _round_up(tn, _LANE)
    tm = max(1, tgt // (padded_tn * itemsize))
    tm = max(sublane, (tm // sublane) * sublane)
    if tm >= rows:
        tm = rows
    row_grid = pl.cdiv(rows, tm)

    # Ensure >= 2 grid steps when possible so v7x can shard across both TCs.
    n_col = 1 if col_grid is None else col_grid
    if row_grid * n_col == 1 and rows >= 2 * sublane:
        tm = _round_up(pl.cdiv(rows, 2), sublane)
        row_grid = pl.cdiv(rows, tm)

    if col_grid is None:
        grid = (row_grid,)
        u_spec = pl.BlockSpec((tm, tn), lambda i: (i, 0))
        o_spec = pl.BlockSpec((tm, tn), lambda i: (i, 0))
        dims = ("parallel",)
        in_specs = [u_spec] + extra_specs
    else:
        grid = (row_grid, col_grid)
        u_spec = pl.BlockSpec((tm, tn), lambda i, j: (i, j))
        o_spec = pl.BlockSpec((tm, tn), lambda i, j: (i, j))
        dims = ("parallel", "parallel")
        in_specs = [u_spec]

    cost = pl.CostEstimate(
        flops=total,                       # one multiply per element
        transcendentals=0,
        bytes_accessed=2 * total * itemsize,
    )

    u2 = u.reshape(work_shape)

    out = pl.pallas_call(
        kernel,
        out_shape=jax.ShapeDtypeStruct(work_shape, u.dtype),
        grid=grid,
        in_specs=in_specs,
        out_specs=o_spec,
        compiler_params=pltpu.CompilerParams(
            dimension_semantics=dims,
            vmem_limit_bytes=_VMEM_LIMIT_BYTES,
        ),
        cost_estimate=cost,
        input_output_aliases=({0: 0} if donate else {}),
    )(u2, *extra_inputs)

    return out.reshape(orig_shape)


def _ref_scaler(u, sf):
    h = u.shape[-1] // 2
    return jnp.concatenate((sf[0] * u[..., :h], sf[1] * u[..., h:]), axis=-1)


if __name__ == "__main__":
    key = jax.random.PRNGKey(0)
    k1, k2, k3 = jax.random.split(key, 3)
    sf = (2.5, 0.5)

    # Primary (module-consistent small shape): D=32 -> lane-dense slab path (B).
    u1 = jax.random.normal(k1, (2, 8, 32), dtype=jnp.float32)
    out1 = jax.block_until_ready(scaler(u1, sf))
    np.testing.assert_allclose(
        np.asarray(out1), np.asarray(_ref_scaler(u1, sf)), rtol=1e-6, atol=1e-6
    )

    # 128-aligned halves -> static-slice split path (A).
    u2 = jax.random.normal(k2, (2, 8, 256), dtype=jnp.float32)
    out2 = jax.block_until_ready(scaler(u2, sf))
    np.testing.assert_allclose(
        np.asarray(out2), np.asarray(_ref_scaler(u2, sf)), rtol=1e-6, atol=1e-6
    )

    # Unaligned last dim that doesn't tile into a 128-slab -> fallback path (C).
    u3 = jax.random.normal(k3, (3, 5, 48), dtype=jnp.float32)
    out3 = jax.block_until_ready(scaler(u3, sf))
    np.testing.assert_allclose(
        np.asarray(out3), np.asarray(_ref_scaler(u3, sf)), rtol=1e-6, atol=1e-6
    )

    print("KERNEL_OK")
</pallas_src>

<mosaic_0001>
module attributes {stable_mosaic.version = 11 : i64} {
  func.func @_row_scale_kernel(%arg0: i32, %arg1: memref<4x128xf32, #tpu.memory_space<vmem>>, %arg2: memref<1x128xf32, #tpu.memory_space<vmem>>, %arg3: memref<4x128xf32, #tpu.memory_space<vmem>>) attributes {dimension_semantics = [#tpu.dimension_semantics<parallel>], iteration_bounds = array<i64: 1>, scalar_prefetch = 0 : i64, scratch_operands = 0 : i64, tpu.core_type = #tpu.core_type<tc>, window_params = [{transform_indices = @transform_0, window_bounds = array<i64: 4, 128>}, {pipeline_mode = #tpu.pipeline_mode<synchronous>, transform_indices = @transform_1, window_bounds = array<i64: 1, 128>}, {transform_indices = @transform_2, window_bounds = array<i64: 4, 128>}]} {
    %c0 = arith.constant 0 : index
    %c0_0 = arith.constant 0 : index
    %0 = vector.load %arg1[%c0, %c0_0] : memref<4x128xf32, #tpu.memory_space<vmem>>, vector<4x128xf32>
    %c0_1 = arith.constant 0 : index
    %c0_2 = arith.constant 0 : index
    %1 = vector.load %arg2[%c0_1, %c0_2] : memref<1x128xf32, #tpu.memory_space<vmem>>, vector<1x128xf32>
    %2 = vector.broadcast %1 : vector<1x128xf32> to vector<4x128xf32>
    %3 = arith.mulf %0, %2 : vector<4x128xf32>
    %c0_3 = arith.constant 0 : index
    %c0_4 = arith.constant 0 : index
    %4 = vector.load %arg3[%c0_3, %c0_4] : memref<4x128xf32, #tpu.memory_space<vmem>>, vector<4x128xf32>
    tpu.vector_store %arg3[%c0_3, %c0_4], %3 {strides = array<i32>} : memref<4x128xf32, #tpu.memory_space<vmem>>, vector<4x128xf32>,
    return
  }
  func.func @transform_0(%arg0: i32) -> (i32, i32) {
    %c0_i32 = arith.constant 0 : i32
    %c0_i32_0 = arith.constant 0 : i32
    return %arg0, %c0_i32 : i32, i32
  }
  func.func @transform_1(%arg0: i32) -> (i32, i32) {
    %c0_i32 = arith.constant 0 : i32
    %c0_i32_0 = arith.constant 0 : i32
    %c0_i32_1 = arith.constant 0 : i32
    return %c0_i32, %c0_i32_0 : i32, i32
  }
  func.func @transform_2(%arg0: i32) -> (i32, i32) {
    %c0_i32 = arith.constant 0 : i32
    %c0_i32_0 = arith.constant 0 : i32
    return %arg0, %c0_i32 : i32, i32
  }
}

</mosaic_0001>

<bundles_post_ra>
// kernel: tpu_custom_call.1
= control target key start
LH: loop header
LB: loop body
LE: loop exit
PB: predicated region body
PF: predicated region fallthrough
CT: control target
= control target key end

     0   :  { %7 = vsyncpa [#allocation3], 0  ;;  %s144_s0 = inlined_call_operand.hbm [shape: f32[4,128], index: 0, kind: input, shape index: {}]   ;;  %s145_s1 = inlined_call_operand.vmem [shape: f32[1,128], index: 1, kind: input, shape index: {}]   ;;  %s146_s2 = inlined_call_operand.hbm [shape: f32[4,128], index: 2, kind: output, shape index: {}]  }
   0x1   :  { %8 = vsyncpa [#allocation4], 0  ;;  %s100_s9 = smov [#allocation2]   ;;  %s52_s13 = scalar_lea.hbm %s144_s0, 64 }
   0x2   :  { %s15_s10 = sshll.u32 %s100_s9, 4  ;;  %p53_p0 = scmp.ne.s32.totalorder %s144_s0, %s52_s13  ;;  %s16_s10 = int_to_ptr.vmem [resolvable:$true] %s15_s10 }
   0x3   :  { %p56_p1 = scmp.lt.u32.totalorder %s52_s13, %s144_s0 }
   0x5   :  { %p58_p2 = pnand %p56_p1, %p53_p0 }
   0x7   :  { %61 = shalt.err (!%p58_p2)
}
   0x8   :  { %s62_s18 = scalar_lea.vmem %s16_s10, 64  ;;  %p67_p4 = scmp.lt.s32.totalorder %s16_s10, %s16_s10 }
   0x9   :  { %p63_p3 = scmp.ne.s32.totalorder %s16_s10, %s62_s18  ;;  %p68_p5 = scmp.lt.s32.totalorder %s62_s18, %s62_s18 }
   0xb   :  { %p69_p6 = por %p68_p5, %p67_p4 }
   0xd   :  { %p70_p7 = pnand %p69_p6, %p63_p3 }
   0xf   :  { %73 = shalt.err (!%p70_p7)
}
  0x10   :  { %18 = dma.hbm_to_vmem [thread:$0]  %s144_s0, 64, %s16_s10, [#allocation3]  }
  0x11   :  { %96 = dma.done.wait [#allocation3], 64  }
  0x12   :  { %97 = vsyncadd [#allocation3], 4294967232  ;;  %s101_s21 = smov [#allocation5]   ;;  %v24_v0 = vld [vmem:[#allocation2] sm:$0xf] }
  0x13   :  { %s40_s22 = sshll.u32 %s101_s21, 4  ;;  %v49_v1 = vld [vmem:[%s145_s1] ss:$0 sm:$0xff]  ;;  %s41_s22 = int_to_ptr.vmem [resolvable:$true] %s40_s22 }
  0x14   :  { %v32_v2 = vmul.f32 %v49_v1, %v24_v0  ;;  %s74_s25 = scalar_lea.vmem %s41_s22, 64  ;;  %p79_p9 = scmp.lt.s32.totalorder %s41_s22, %s41_s22 }
  0x15   :  { %p75_p8 = scmp.ne.s32.totalorder %s41_s22, %s74_s25  ;;  %p80_p10 = scmp.lt.s32.totalorder %s74_s25, %s74_s25 }
  0x16   :  { %33 = vst [vmem:[#allocation5] sm:$0xf] %v32_v2 }
  0x17   :  { %p81_p11 = por %p80_p10, %p79_p9 }
  0x19   :  { %p82_p12 = pnand %p81_p11, %p75_p8 }
  0x1b   :  { %85 = shalt.err (!%p82_p12)
}
  0x1c   :  { %s86_s27 = scalar_lea.hbm %s146_s2, 64 }
  0x1d   :  { %p87_p13 = scmp.ne.s32.totalorder %s146_s2, %s86_s27  ;;  %p90_p0 = scmp.lt.u32.totalorder %s86_s27, %s146_s2 }
  0x1f   :  { %p92_p1 = pnand %p90_p0, %p87_p13 }
  0x21   :  { %95 = shalt.err (!%p92_p1)
}
  0x22   :  { %43 = dma.vmem_to_hbm [thread:$0]  %s41_s22, 64, %s146_s2, [#allocation4]  }
  0x23   :  { %98 = dma.done.wait [#allocation4], 64  }
  0x24   :  { %99 = vsyncadd [#allocation4], 4294967232 }
  0x25   :  { %47 = vsyncpa [#allocation3], 1 }
  0x26   :  { %48 = vsyncpa [#allocation4], 1 }

</bundles_post_ra>
